<compile_context>
chip_gen: v6e
topology: v6e:2x2x1
jax: 0.10.0
libtpu: 0.0.40
codegen_flags: <defaults>
</compile_context>

<pallas_src>
import math

import jax
import jax.numpy as jnp
from jax.experimental import pallas as pl
from jax.experimental.pallas import tpu as pltpu

GELU_C = math.sqrt(2.0 / math.pi)


def _round_up(v, m):
    return ((v + m - 1) // m) * m


def _cdiv(a, b):
    return -(-a // b)


# ---------------------------------------------------------------------------
# Kernel body: one (tm, E_pad) row tile, hidden dim streamed in tf-wide slices.
# ---------------------------------------------------------------------------
def _ffn_kernel(x_ref, w1_ref, b1_ref, w2_ref, b2_ref, o_ref, acc_ref):
    # x_ref:  (tm, E_pad)    w1_ref: (E_pad, tf)   b1_ref: (1, tf)
    # w2_ref: (tf, E_pad)    b2_ref: (1, E_pad)
    # o_ref:  (tm, E_pad)    acc_ref: (tm, E_pad) f32 scratch, resident over k
    k = pl.program_id(1)

    @pl.when(k == 0)
    def _():
        acc_ref[...] = jnp.zeros_like(acc_ref)

    # First matmul (native-dtype MXU operands, f32 accumulation) + bias slice.
    h = jnp.dot(x_ref[...], w1_ref[...], preferred_element_type=jnp.float32)
    h = h + b1_ref[...].astype(jnp.float32)

    # Tanh-approx GELU in f32 (tanh lands on the EUP); matches the PyTorch
    # formula: 0.5*x*(1 + tanh(sqrt(2/pi)*(x + 0.044715*x^3))).
    h_act = 0.5 * h * (1.0 + jnp.tanh(GELU_C * (h * (1.0 + 0.044715 * h * h))))

    # Second matmul: feed the MXU in the weight dtype, accumulate in f32.
    acc_ref[...] += jnp.dot(h_act.astype(w2_ref.dtype), w2_ref[...],
                            preferred_element_type=jnp.float32)

    @pl.when(k == pl.num_programs(1) - 1)
    def _():
        o_ref[...] = (acc_ref[...]
                      + b2_ref[...].astype(jnp.float32)).astype(o_ref.dtype)


# ---------------------------------------------------------------------------
# Device-aware configuration helpers.
# ---------------------------------------------------------------------------
def _device_kind():
    try:
        return jax.devices()[0].device_kind.lower()
    except Exception:
        return ""


def _vmem_limit_bytes():
    # ~80% of physical VMEM per TensorCore (128 MiB v5e/v6e, 64 MiB v7x).
    try:
        cap = int(pltpu.get_tpu_info().vmem_capacity_bytes)
    except Exception:
        cap = 64 * 1024 * 1024  # conservative fallback
    return int(cap * 0.8)


def _tile_targets(kind):
    # (tm_target, tf_target) from the HBM-vs-MXU roofline of each generation:
    #   v5e: ~240 flop/B needed, 1 vst slot -> modest tm
    #   v6e: ~660 flop/B, 128 MiB VMEM     -> big tm
    #   v7x: ~310 flop/B per TC, 64 MiB/TC -> tm=512, tf=256, >=2 row tiles
    if "v5" in kind:
        return 384, 512
    if "v6" in kind:
        return 1024, 512
    if "v7" in kind:
        return 512, 256
    return 512, 512


def _weight_spec(shape, index_map, buffers):
    # Optional deeper pipelining for weight slices (v5e exposed-DMA case).
    if buffers and buffers > 2:
        try:
            return pl.BlockSpec(shape, index_map, pipeline_mode=pl.Buffered(buffers))
        except Exception:
            pass
    return pl.BlockSpec(shape, index_map)


# ---------------------------------------------------------------------------
# Public wrapper.
# ---------------------------------------------------------------------------
def feedforward_pallas(x, w1, b1, w2, b2, *, tm=None, tf=None,
                       operand_dtype=jnp.bfloat16, weight_buffers=None):
    """x: (..., E) -> (..., E). Fused position-wise FFN as one Pallas kernel."""
    orig_shape = x.shape
    E, F = w1.shape
    x2d = x.reshape(-1, E)
    M = x2d.shape[0]

    operand_dtype = jnp.dtype(operand_dtype)
    out_dtype = x.dtype
    ob = operand_dtype.itemsize
    outb = jnp.dtype(out_dtype).itemsize

    kind = _device_kind()
    tm_target, tf_target = _tile_targets(kind)
    if tm is not None:
        tm_target = max(8, int(tm))
    if tf is not None:
        tf_target = max(128, _round_up(int(tf), 128))
    wbuf = 2 if weight_buffers is None else max(2, int(weight_buffers))

    # ---- alignment (lane = 128, sublane tile depends on operand packing) ----
    row_align = 8 * max(1, 4 // ob)            # 8 for f32, 16 for bf16
    E_pad = _round_up(E, 128)
    M_al = _round_up(max(M, row_align), row_align)
    F_128 = _round_up(F, 128)

    tm_target = min(_round_up(tm_target, row_align), M_al)
    tf_target = min(tf_target, F_128)

    # ---- shrink tiles until the VMEM footprint fits the scoped budget -------
    vmem_limit = _vmem_limit_bytes()

    def footprint(tm_, tf_):
        return (4 * tm_ * E_pad                 # f32 accumulator scratch
                + 2 * tm_ * E_pad * ob          # double-buffered x tile
                + 2 * tm_ * E_pad * outb        # double-buffered out tile
                + wbuf * E_pad * tf_ * ob       # w1 slice buffers
                + wbuf * tf_ * E_pad * ob       # w2 slice buffers
                + 2 * tf_ * 4 + 2 * E_pad * 4)  # bias buffers

    while footprint(tm_target, tf_target) > int(0.85 * vmem_limit) and tm_target > 256:
        tm_target -= 128
    while footprint(tm_target, tf_target) > int(0.85 * vmem_limit) and tf_target > 128:
        tf_target -= 128
    tm_target = max(tm_target, row_align)

    # ---- adaptive row tiling: slack < one sublane tile per row tile ---------
    n_i = max(1, _cdiv(M_al, tm_target))
    if "v7" in kind and M_al >= 256 and n_i < 2:
        n_i = 2                                  # keep both v7x TensorCores busy
    tm_final = _round_up(_cdiv(M_al, n_i), row_align)
    M_pad = n_i * tm_final

    n_k = max(1, _cdiv(F_128, tf_target))
    tf_final = _round_up(_cdiv(F_128, n_k), 128)
    F_pad = n_k * tf_final

    # ---- cast operands to the MXU dtype, zero-pad (zeros are exact) ---------
    # TODO(synk): for production, pad/cast w1/w2 once at parameter init instead
    # of per call (this is a no-op when E/F are already 128-multiples).
    x_p = x2d.astype(operand_dtype)
    if (M_pad, E_pad) != (M, E):
        x_p = jnp.pad(x_p, ((0, M_pad - M), (0, E_pad - E)))
    w1_p = w1.astype(operand_dtype)
    if (E_pad, F_pad) != (E, F):
        w1_p = jnp.pad(w1_p, ((0, E_pad - E), (0, F_pad - F)))
    w2_p = w2.astype(operand_dtype)
    if (F_pad, E_pad) != (F, E):
        w2_p = jnp.pad(w2_p, ((0, F_pad - F), (0, E_pad - E)))
    b1_p = (b1 if F_pad == F else jnp.pad(b1, (0, F_pad - F)))
    b1_p = b1_p.astype(jnp.float32).reshape(1, F_pad)
    b2_p = (b2 if E_pad == E else jnp.pad(b2, (0, E_pad - E)))
    b2_p = b2_p.astype(jnp.float32).reshape(1, E_pad)

    cost = pl.CostEstimate(
        flops=4 * M * E * F,                         # two matmuls
        transcendentals=M * F,                       # tanh per hidden activation
        bytes_accessed=(M * E * ob                   # x read
                        + n_i * 2 * E * F * ob       # weights re-streamed per row tile
                        + (E + F) * 4                # biases
                        + M * E * outb),             # output write
    )

    out = pl.pallas_call(
        _ffn_kernel,
        out_shape=jax.ShapeDtypeStruct((M_pad, E_pad), out_dtype),
        grid_spec=pltpu.PrefetchScalarGridSpec(
            num_scalar_prefetch=0,
            grid=(n_i, n_k),
            in_specs=[
                pl.BlockSpec((tm_final, E_pad), lambda i, k: (i, 0)),   # x rows
                _weight_spec((E_pad, tf_final), lambda i, k: (0, k), wbuf),  # w1
                pl.BlockSpec((1, tf_final), lambda i, k: (0, k)),       # b1 slice
                _weight_spec((tf_final, E_pad), lambda i, k: (k, 0), wbuf),  # w2
                pl.BlockSpec((1, E_pad), lambda i, k: (0, 0)),          # b2
            ],
            out_specs=pl.BlockSpec((tm_final, E_pad), lambda i, k: (i, 0)),
            scratch_shapes=[pltpu.VMEM((tm_final, E_pad), jnp.float32)],
        ),
        compiler_params=pltpu.CompilerParams(
            dimension_semantics=("parallel", "arbitrary"),
            vmem_limit_bytes=vmem_limit),
        cost_estimate=cost,
    )(x_p, w1_p, b1_p, w2_p, b2_p)

    return out[:M, :E].reshape(orig_shape)


# ---------------------------------------------------------------------------
# Reference + tests.
# ---------------------------------------------------------------------------
def feedforward_reference(x, w1, b1, w2, b2, operand_dtype=jnp.bfloat16):
    """Plain JAX reference mirroring the PyTorch forward with the same operand
    dtype (autocast-like) and f32 accumulation / f32 GELU."""
    od = jnp.dtype(operand_dtype)
    h = jnp.matmul(x.astype(od), w1.astype(od),
                   preferred_element_type=jnp.float32) + b1.astype(jnp.float32)
    h_act = 0.5 * h * (1.0 + jnp.tanh(GELU_C * (h + 0.044715 * h ** 3)))
    out = jnp.matmul(h_act.astype(od), w2.astype(od),
                     preferred_element_type=jnp.float32) + b2.astype(jnp.float32)
    return out.astype(x.dtype)


def he_init(key, shape, fan_in, dtype=jnp.float32):
    # TensorOps.he_init: normal with std = sqrt(2 / fan_in)
    std = math.sqrt(2.0 / fan_in)
    return jax.random.normal(key, shape, dtype=dtype) * std


def _run_case(key, batch, seq, embed_dim, ff_dim, *, operand_dtype=jnp.bfloat16,
              atol=1e-2, rtol=1e-2, **kw):
    k_x, k_w1, k_w2 = jax.random.split(key, 3)
    x = jax.random.normal(k_x, (batch, seq, embed_dim), dtype=jnp.float32)
    w1 = he_init(k_w1, (embed_dim, ff_dim), embed_dim)
    b1 = jnp.zeros((ff_dim,), dtype=jnp.float32)
    w2 = he_init(k_w2, (ff_dim, embed_dim), ff_dim)
    b2 = jnp.zeros((embed_dim,), dtype=jnp.float32)

    out = jax.block_until_ready(
        feedforward_pallas(x, w1, b1, w2, b2, operand_dtype=operand_dtype, **kw))
    ref = feedforward_reference(x, w1, b1, w2, b2, operand_dtype=operand_dtype)
    assert out.shape == (batch, seq, embed_dim)
    assert jnp.allclose(out, ref, atol=atol, rtol=rtol), (
        f"mismatch vs reference (max abs err "
        f"{float(jnp.max(jnp.abs(out - ref))):.3e})")


if __name__ == "__main__":
    key = jax.random.PRNGKey(0)
    k1, k2, k3, k4 = jax.random.split(key, 4)

    # Config implied by the module: transformer.{embed_dim, ff_dim},
    # feedforward.{activation='gelu', dropout_rate=0.0, use_bias=True, init='he'}
    _run_case(k1, batch=2, seq=8, embed_dim=32, ff_dim=64)

    # Multi-step grid on both axes (>=2 row tiles x 2 hidden-dim accumulation
    # steps) with the default bf16 operand path.
    _run_case(k2, batch=4, seq=64, embed_dim=128, ff_dim=256, tm=128, tf=128)

    # Exact f32 operand path with non-128-aligned dims (exercises padding).
    _run_case(k3, batch=2, seq=10, embed_dim=40, ff_dim=72,
              operand_dtype=jnp.float32, atol=1e-4, rtol=1e-4)

    # Exact f32 operand path with 3 hidden-dim accumulation steps (validates
    # the accumulator init/finalize logic at tight tolerance).
    _run_case(k4, batch=2, seq=32, embed_dim=128, ff_dim=384, tm=64, tf=128,
              operand_dtype=jnp.float32, atol=1e-4, rtol=1e-4)

    print("KERNEL_OK")
</pallas_src>

<mosaic_0001>
module attributes {stable_mosaic.version = 11 : i64} {
  func.func @_ffn_kernel(%arg0: i32, %arg1: i32, %arg2: memref<16x128xbf16, #tpu.memory_space<vmem>>, %arg3: memref<128x128xbf16, #tpu.memory_space<vmem>>, %arg4: memref<1x128xf32, #tpu.memory_space<vmem>>, %arg5: memref<128x128xbf16, #tpu.memory_space<vmem>>, %arg6: memref<1x128xf32, #tpu.memory_space<vmem>>, %arg7: memref<16x128xf32, #tpu.memory_space<vmem>>, %arg8: memref<16x128xf32, #tpu.memory_space<vmem>>) attributes {dimension_semantics = [#tpu.dimension_semantics<parallel>, #tpu.dimension_semantics<arbitrary>], iteration_bounds = array<i64: 1, 1>, scalar_prefetch = 0 : i64, scratch_operands = 1 : i64, tpu.core_type = #tpu.core_type<tc>, window_params = [{transform_indices = @transform_0, window_bounds = array<i64: 16, 128>}, {transform_indices = @transform_1, window_bounds = array<i64: 128, 128>}, {transform_indices = @transform_2, window_bounds = array<i64: 1, 128>}, {transform_indices = @transform_3, window_bounds = array<i64: 128, 128>}, {pipeline_mode = #tpu.pipeline_mode<synchronous>, transform_indices = @transform_4, window_bounds = array<i64: 1, 128>}, {transform_indices = @transform_5, window_bounds = array<i64: 16, 128>}]} {
    %c0_i32 = arith.constant 0 : i32
    %0 = arith.cmpi eq, %arg1, %c0_i32 : i32
    %1 = arith.extui %0 : i1 to i32
    %c0_i32_0 = arith.constant 0 : i32
    %2 = arith.cmpi ne, %1, %c0_i32_0 : i32
    scf.if %2 {
      %cst_20 = arith.constant 0.000000e+00 : f32
      %32 = vector.broadcast %cst_20 : f32 to vector<16x128xf32>
      %c0_21 = arith.constant 0 : index
      %c0_22 = arith.constant 0 : index
      %33 = vector.load %arg8[%c0_21, %c0_22] : memref<16x128xf32, #tpu.memory_space<vmem>>, vector<16x128xf32>
      tpu.vector_store %arg8[%c0_21, %c0_22], %32 {strides = array<i32>} : memref<16x128xf32, #tpu.memory_space<vmem>>, vector<16x128xf32>,
    } else {
    }
    %c0 = arith.constant 0 : index
    %c0_1 = arith.constant 0 : index
    %3 = vector.load %arg2[%c0, %c0_1] : memref<16x128xbf16, #tpu.memory_space<vmem>>, vector<16x128xbf16>
    %c0_2 = arith.constant 0 : index
    %c0_3 = arith.constant 0 : index
    %4 = vector.load %arg3[%c0_2, %c0_3] : memref<128x128xbf16, #tpu.memory_space<vmem>>, vector<128x128xbf16>
    %cst = arith.constant dense<0.000000e+00> : vector<16x128xf32>
    %5 = tpu.matmul %3, %4, %cst {dimension_numbers = #tpu.dot_dimension_numbers<[1], [0], [0], [1], [0, 0, 1, 1], [], []>} : vector<16x128xbf16>, vector<128x128xbf16>, vector<16x128xf32> -> vector<16x128xf32>
    %c0_4 = arith.constant 0 : index
    %c0_5 = arith.constant 0 : index
    %6 = vector.load %arg4[%c0_4, %c0_5] : memref<1x128xf32, #tpu.memory_space<vmem>>, vector<1x128xf32>
    %7 = vector.broadcast %6 : vector<1x128xf32> to vector<16x128xf32>
    %8 = arith.addf %5, %7 : vector<16x128xf32>
    %cst_6 = arith.constant 5.000000e-01 : f32
    %9 = vector.broadcast %cst_6 : f32 to vector<16x128xf32>
    %10 = arith.mulf %9, %8 : vector<16x128xf32>
    %cst_7 = arith.constant 4.471500e-02 : f32
    %11 = vector.broadcast %cst_7 : f32 to vector<16x128xf32>
    %12 = arith.mulf %11, %8 : vector<16x128xf32>
    %13 = arith.mulf %12, %8 : vector<16x128xf32>
    %cst_8 = arith.constant 1.000000e+00 : f32
    %14 = vector.broadcast %cst_8 : f32 to vector<16x128xf32>
    %15 = arith.addf %14, %13 : vector<16x128xf32>
    %16 = arith.mulf %8, %15 : vector<16x128xf32>
    %cst_9 = arith.constant 0.797884583 : f32
    %17 = vector.broadcast %cst_9 : f32 to vector<16x128xf32>
    %18 = arith.mulf %17, %16 : vector<16x128xf32>
    %19 = math.tanh %18 : vector<16x128xf32>
    %cst_10 = arith.constant 1.000000e+00 : f32
    %20 = vector.broadcast %cst_10 : f32 to vector<16x128xf32>
    %21 = arith.addf %20, %19 : vector<16x128xf32>
    %22 = arith.mulf %10, %21 : vector<16x128xf32>
    %c0_11 = arith.constant 0 : index
    %c0_12 = arith.constant 0 : index
    %23 = vector.load %arg8[%c0_11, %c0_12] : memref<16x128xf32, #tpu.memory_space<vmem>>, vector<16x128xf32>
    %24 = arith.truncf %22 : vector<16x128xf32> to vector<16x128xbf16>
    %c0_13 = arith.constant 0 : index
    %c0_14 = arith.constant 0 : index
    %25 = vector.load %arg5[%c0_13, %c0_14] : memref<128x128xbf16, #tpu.memory_space<vmem>>, vector<128x128xbf16>
    %cst_15 = arith.constant dense<0.000000e+00> : vector<16x128xf32>
    %26 = tpu.matmul %24, %25, %cst_15 {dimension_numbers = #tpu.dot_dimension_numbers<[1], [0], [0], [1], [0, 0, 1, 1], [], []>} : vector<16x128xbf16>, vector<128x128xbf16>, vector<16x128xf32> -> vector<16x128xf32>
    %27 = arith.addf %23, %26 : vector<16x128xf32>
    %c0_16 = arith.constant 0 : index
    %c0_17 = arith.constant 0 : index
    %28 = vector.load %arg8[%c0_16, %c0_17] : memref<16x128xf32, #tpu.memory_space<vmem>>, vector<16x128xf32>
    tpu.vector_store %arg8[%c0_16, %c0_17], %27 {strides = array<i32>} : memref<16x128xf32, #tpu.memory_space<vmem>>, vector<16x128xf32>,
    %c0_i32_18 = arith.constant 0 : i32
    %29 = arith.cmpi eq, %arg1, %c0_i32_18 : i32
    %30 = arith.extui %29 : i1 to i32
    %c0_i32_19 = arith.constant 0 : i32
    %31 = arith.cmpi ne, %30, %c0_i32_19 : i32
    scf.if %31 {
      %c0_20 = arith.constant 0 : index
      %c0_21 = arith.constant 0 : index
      %32 = vector.load %arg8[%c0_20, %c0_21] : memref<16x128xf32, #tpu.memory_space<vmem>>, vector<16x128xf32>
      %c0_22 = arith.constant 0 : index
      %c0_23 = arith.constant 0 : index
      %33 = vector.load %arg6[%c0_22, %c0_23] : memref<1x128xf32, #tpu.memory_space<vmem>>, vector<1x128xf32>
      %34 = vector.broadcast %33 : vector<1x128xf32> to vector<16x128xf32>
      %35 = arith.addf %32, %34 : vector<16x128xf32>
      %c0_24 = arith.constant 0 : index
      %c0_25 = arith.constant 0 : index
      %36 = vector.load %arg7[%c0_24, %c0_25] : memref<16x128xf32, #tpu.memory_space<vmem>>, vector<16x128xf32>
      tpu.vector_store %arg7[%c0_24, %c0_25], %35 {strides = array<i32>} : memref<16x128xf32, #tpu.memory_space<vmem>>, vector<16x128xf32>,
    } else {
    }
    return
  }
  func.func @transform_0(%arg0: i32, %arg1: i32) -> (i32, i32) {
    %c0_i32 = arith.constant 0 : i32
    %c0_i32_0 = arith.constant 0 : i32
    return %arg0, %c0_i32 : i32, i32
  }
  func.func @transform_1(%arg0: i32, %arg1: i32) -> (i32, i32) {
    %c0_i32 = arith.constant 0 : i32
    %c0_i32_0 = arith.constant 0 : i32
    return %c0_i32, %arg1 : i32, i32
  }
  func.func @transform_2(%arg0: i32, %arg1: i32) -> (i32, i32) {
    %c0_i32 = arith.constant 0 : i32
    %c0_i32_0 = arith.constant 0 : i32
    return %c0_i32, %arg1 : i32, i32
  }
  func.func @transform_3(%arg0: i32, %arg1: i32) -> (i32, i32) {
    %c0_i32 = arith.constant 0 : i32
    %c0_i32_0 = arith.constant 0 : i32
    return %arg1, %c0_i32 : i32, i32
  }
  func.func @transform_4(%arg0: i32, %arg1: i32) -> (i32, i32) {
    %c0_i32 = arith.constant 0 : i32
    %c0_i32_0 = arith.constant 0 : i32
    %c0_i32_1 = arith.constant 0 : i32
    return %c0_i32, %c0_i32_0 : i32, i32
  }
  func.func @transform_5(%arg0: i32, %arg1: i32) -> (i32, i32) {
    %c0_i32 = arith.constant 0 : i32
    %c0_i32_0 = arith.constant 0 : i32
    return %arg0, %c0_i32 : i32, i32
  }
}

</mosaic_0001>

<bundles_post_ra>
// kernel: tpu_custom_call.1
= control target key start
LH: loop header
LB: loop body
LE: loop exit
PB: predicated region body
PF: predicated region fallthrough
CT: control target
= control target key end

     0   :  { %10 = vsyncpa [#allocation4], 0  ;;  %s605_s0 = inlined_call_operand.hbm [shape: bf16[16,128], index: 0, kind: input, shape index: {}]   ;;  %s606_s1 = inlined_call_operand.hbm [shape: bf16[128,128], index: 1, kind: input, shape index: {}]   ;;  %s607_s2 = inlined_call_operand.vmem [shape: f32[1,128], index: 2, kind: input, shape index: {}]   ;;  %s608_s3 = inlined_call_operand.hbm [shape: bf16[128,128], index: 3, kind: input, shape index: {}]   ;;  %s609_s4 = inlined_call_operand.vmem [shape: f32[1,128], index: 4, kind: input, shape index: {}]   ;;  %s610_s5 = inlined_call_operand.hbm [shape: f32[16,128], index: 5, kind: output, shape index: {}]  }
   0x1   :  { %11 = vsyncpa [#allocation7], 0 }
   0x2   :  { %12 = vsyncpa [#allocation5], 0  ;;  %s547_s18 = smov [#allocation6]   ;;  %s548_s20 = smov [#allocation3]  }
   0x3   :  { %s30_s19 = sshll.u32 %s547_s18, 4  ;;  %s18_s21 = sshll.u32 %s548_s20, 4  ;;  %s31_s19 = int_to_ptr.vmem [resolvable:$true] %s30_s19  ;;  %s19_s21 = int_to_ptr.vmem [resolvable:$true] %s18_s21 }
   0x4   :  { %s469_s22 = scalar_lea.vmem %s31_s19, 1024  ;;  %p474_p1 = scmp.lt.s32.totalorder %s31_s19, %s31_s19 }
   0x5   :  { %p470_p0 = scmp.ne.s32.totalorder %s31_s19, %s469_s22  ;;  %p475_p2 = scmp.lt.s32.totalorder %s469_s22, %s469_s22 }
   0x7   :  { %p476_p3 = por %p475_p2, %p474_p1 }
   0x9   :  { %p477_p4 = pnand %p476_p3, %p470_p0 }
   0xb   :  { %480 = shalt.err (!%p477_p4)
}
   0xc   :  { %s549_s23 = smov 64   ;;  %s550_s24 = smov 4  }
   0xd   :  { %36 = dma.hbm_to_vmem [thread:$0]  %s606_s1, 1024, %s31_s19, [#allocation7], %s549_s23, %s549_s23, %s550_s24  }
   0xe   :  { %s489_s27 = scalar_lea.vmem %s19_s21, 128  ;;  %p494_p6 = scmp.lt.s32.totalorder %s19_s21, %s19_s21 }
   0xf   :  { %p490_p5 = scmp.ne.s32.totalorder %s19_s21, %s489_s27  ;;  %p495_p7 = scmp.lt.s32.totalorder %s489_s27, %s489_s27 }
  0x11   :  { %p496_p8 = por %p495_p7, %p494_p6 }
  0x13   :  { %p497_p9 = pnand %p496_p8, %p490_p5 }
  0x15   :  { %500 = shalt.err (!%p497_p9)
}
  0x16   :  { %24 = dma.hbm_to_vmem [thread:$0]  %s605_s0, 128, %s19_s21, [#allocation4], %s549_s23, %s549_s23, %s550_s24  }
  0x17   :  { %s551_s30 = smov [#allocation8]  }
  0x18   :  { %s44_s6 = sshll.u32 %s551_s30, 4  ;;  %s45_s6 = int_to_ptr.vmem [resolvable:$true] %s44_s6 }
  0x19   :  { %s509_s7 = scalar_lea.vmem %s45_s6, 1024  ;;  %p514_p11 = scmp.lt.s32.totalorder %s45_s6, %s45_s6 }
  0x1a   :  { %p510_p10 = scmp.ne.s32.totalorder %s45_s6, %s509_s7  ;;  %p515_p12 = scmp.lt.s32.totalorder %s509_s7, %s509_s7 }
  0x1c   :  { %p516_p13 = por %p515_p12, %p514_p11 }
  0x1e   :  { %p517_p0 = pnand %p516_p13, %p510_p10 }
  0x20   :  { %520 = shalt.err (!%p517_p0)
}
  0x21   :  { %50 = dma.hbm_to_vmem [thread:$0]  %s608_s3, 1024, %s45_s6, [#allocation7], %s549_s23, %s549_s23, %s550_s24  }
  0x22   :  { %541 = dma.done.wait [#allocation4], 128  }
  0x23   :  { %542 = vsyncadd [#allocation4], 4294967168 }
  0x24   :  { %543 = dma.done.wait [#allocation7], 2048  }
  0x25   :  { %544 = vsyncadd [#allocation7], 4294965248  ;;  %v552_v0 = vmov 0.0   ;;  %vm553_vm0 = vmmov 0   ;;  %v440_v1 = vld [vmem:[#allocation6 + $0x38] sm:$0xff]   ;;  %v441_v2 = vld [vmem:[#allocation6 + $0x30] sm:$0xff]  }
  0x26   :  { %390 = vmatprep.subr.bf16.mxu0 %v552_v0  ;;  %406 = vmatprep.mubr.msk.bf16.mxu0 %vm553_vm0, %v552_v0  ;;  %v442_v3 = vld [vmem:[#allocation6 + $0x28] sm:$0xff]   ;;  %v443_v4 = vld [vmem:[#allocation6 + $0x20] sm:$0xff]   ;;  %v444_v5 = vld [vmem:[#allocation6 + $0x18] sm:$0xff]   ;;  %s554_s10 = smov [#allocation9]  }
  0x27   :  { %410 = vmatprep.subr.bf16.mxu1 %v552_v0  ;;  %426 = vmatprep.mubr.msk.bf16.mxu1 %vm553_vm0, %v552_v0  ;;  %v445_v6 = vld [vmem:[#allocation6 + $0x10] sm:$0xff]   ;;  %v446_v7 = vld [vmem:[#allocation6 + $0x8] sm:$0xff]   ;;  %v447_v8 = vld [vmem:[#allocation6] sm:$0xff]   ;;  %s340_s11 = sshll.u32 %s554_s10, 4  ;;  %s341_s11 = int_to_ptr.vmem [resolvable:$true] %s340_s11 }
  0x28   :  { %391 = vmatpush3.bf16.msra.mxu0 %v440_v1  ;;  %v448_v9 = vld [vmem:[#allocation3] sm:$0xff]   ;;  %v450_v11 = vld [vmem:[#allocation8 + $0x30] sm:$0xff]   ;;  %v451_v12 = vld [vmem:[#allocation8 + $0x28] sm:$0xff]   ;;  %s521_s12 = scalar_lea.vmem %s341_s11, 256  ;;  %p526_p2 = scmp.lt.s32.totalorder %s341_s11, %s341_s11 }
  0x29   :  { %392 = vmatprep.subr.bf16.mxu0 %v552_v0  ;;  %v449_v10 = vld [vmem:[#allocation8 + $0x38] sm:$0xff]   ;;  %v452_v13 = vld [vmem:[#allocation8 + $0x20] sm:$0xff]   ;;  %v454_v15 = vld [vmem:[#allocation8 + $0x10] sm:$0xff]   ;;  %p522_p1 = scmp.ne.s32.totalorder %s341_s11, %s521_s12  ;;  %p527_p3 = scmp.lt.s32.totalorder %s521_s12, %s521_s12 }
  0x2a   :  { %411 = vmatpush3.bf16.msra.mxu1 %v449_v10  ;;  %v453_v14 = vld [vmem:[#allocation8 + $0x18] sm:$0xff]   ;;  %v455_v16 = vld [vmem:[#allocation8 + $0x8] sm:$0xff]   ;;  %v456_v17 = vld [vmem:[#allocation8] sm:$0xff]  }
  0x2b   :  { %412 = vmatprep.subr.bf16.mxu1 %v552_v0  ;;  %v353_v18 = vld [vmem:[%s607_s2] ss:$0 sm:$0xff]  ;;  %p528_p4 = por %p527_p3, %p526_p2 }
  0x2c   :  { %393 = vmatpush3.bf16.msra.mxu0 %v441_v2  ;;  %v371_v44 = vld [vmem:[%s609_s4] ss:$0 sm:$0xff] }
  0x2d   :  { %394 = vmatprep.subr.bf16.mxu0 %v552_v0  ;;  %p529_p5 = pnand %p528_p4, %p522_p1 }
  0x2e   :  { %413 = vmatpush3.bf16.msra.mxu1 %v450_v11 }
  0x2f   :  { %414 = vmatprep.subr.bf16.mxu1 %v552_v0 }
  0x30   :  { %395 = vmatpush3.bf16.msra.mxu0 %v442_v3 }
  0x31   :  { %396 = vmatprep.subr.bf16.mxu0 %v552_v0 }
  0x32   :  { %415 = vmatpush3.bf16.msra.mxu1 %v451_v12 }
  0x33   :  { %416 = vmatprep.subr.bf16.mxu1 %v552_v0 }
  0x34   :  { %397 = vmatpush3.bf16.msra.mxu0 %v443_v4 }
  0x35   :  { %398 = vmatprep.subr.bf16.mxu0 %v552_v0 }
  0x36   :  { %417 = vmatpush3.bf16.msra.mxu1 %v452_v13 }
  0x37   :  { %418 = vmatprep.subr.bf16.mxu1 %v552_v0 }
  0x38   :  { %399 = vmatpush3.bf16.msra.mxu0 %v444_v5 }
  0x39   :  { %400 = vmatprep.subr.bf16.mxu0 %v552_v0 }
  0x3a   :  { %419 = vmatpush3.bf16.msra.mxu1 %v453_v14 }
  0x3b   :  { %420 = vmatprep.subr.bf16.mxu1 %v552_v0 }
  0x3c   :  { %401 = vmatpush3.bf16.msra.mxu0 %v445_v6 }
  0x3d   :  { %402 = vmatprep.subr.bf16.mxu0 %v552_v0 }
  0x3e   :  { %421 = vmatpush3.bf16.msra.mxu1 %v454_v15 }
  0x3f   :  { %422 = vmatprep.subr.bf16.mxu1 %v552_v0 }
  0x40   :  { %403 = vmatpush3.bf16.msra.mxu0 %v446_v7 }
  0x41   :  { %404 = vmatprep.subr.bf16.mxu0 %v552_v0 }
  0x42   :  { %423 = vmatpush3.bf16.msra.mxu1 %v455_v16 }
  0x43   :  { %424 = vmatprep.subr.bf16.mxu1 %v552_v0 }
  0x44   :  { %405 = vmatpush3.bf16.msra.mxu0 %v447_v8 }
  0x46   :  { %425 = vmatpush3.bf16.msra.mxu1 %v456_v17 }
  0x47   :  { %407 = vmatmul.mubr.bf16.vlgmr.msra.gmra.mxu0 %v448_v9 }
 0x107   :  { %v182_v19 = vpop.f32.mrf.mxu0 }
 0x108   :  { %v183_v20 = vadd.f32 %v353_v18, %v182_v19 }
 0x109   :  { %v408_v21 = vpop.f32.mrf.mxu0 }
 0x10a   :  { %v191_v22 = vmul.f32 0.044715, %v183_v20  ;;  %v189_v38 = vmul.f32 0.5, %v183_v20 }
 0x10b   :  { %v185_v23 = vpop.f32.mrf.mxu0 }
 0x10c   :  { %v193_v24 = vmul.f32 %v191_v22, %v183_v20  ;;  %v186_v25 = vadd.f32 %v353_v18, %v185_v23 }
 0x10d   :  { %v409_v26 = vpop.f32.mrf.mxu0 }
 0x10e   :  { %v195_v27 = vadd.f32 1.0, %v193_v24  ;;  %v192_v28 = vmul.f32 0.044715, %v186_v25  ;;  %v190_v39 = vmul.f32 0.5, %v186_v25 }
 0x110   :  { %v197_v29 = vmul.f32 %v195_v27, %v183_v20  ;;  %v194_v30 = vmul.f32 %v192_v28, %v186_v25 }
 0x112   :  { %v199_v31 = vmul.f32 0.7978846, %v197_v29  ;;  %v196_v32 = vadd.f32 1.0, %v194_v30 }
 0x114   :  { %457 = vtanh.f32 %v199_v31  ;;  %v198_v33 = vmul.f32 %v196_v32, %v186_v25 }
 0x116   :  { %v200_v34 = vmul.f32 0.7978846, %v198_v33 }
 0x118   :  { %459 = vtanh.f32 %v200_v34 }
 0x121   :  { %v458_v35 = vpop.eup %457 }
 0x122   :  { %v203_v36 = vadd.f32 1.0, %v458_v35 }
 0x124   :  { %v205_v41 = vmul.f32 %v203_v36, %v189_v38 }
 0x125   :  { %v460_v37 = vpop.eup %459 }
 0x126   :  { %v204_v40 = vadd.f32 1.0, %v460_v37 }
 0x128   :  { %v206_v42 = vmul.f32 %v204_v40, %v190_v39 }
 0x12a   :  { %v209_v43 = vpack.c.bf16 %v206_v42, %v205_v41 }
 0x12c   :  { %427 = vmatmul.mubr.bf16.vlgmr.msra.gmra.mxu1 %v209_v43 }
 0x1ec   :  { %v308_v45 = vpop.f32.mrf.mxu1 }
 0x1ed   :  { %v331_v46 = vadd.f32 %v371_v44, %v308_v45 }
 0x1ee   :  { %v428_v47 = vpop.f32.mrf.mxu1 }
 0x1ef   :  { %333 = vst [vmem:[#allocation9] sm:$0xff] %v331_v46 }
 0x1f0   :  { %v311_v48 = vpop.f32.mrf.mxu1 }
 0x1f1   :  { %v332_v49 = vadd.f32 %v371_v44, %v311_v48 }
 0x1f2   :  { %v429_v50 = vpop.f32.mrf.mxu1 }
 0x1f3   :  { %334 = vst [vmem:[#allocation9 + $0x8] sm:$0xff] %v332_v49 }
 0x1f4   :  { %532 = shalt.err (!%p529_p5)
}
 0x1f5   :  { %s555_s13 = smov 128   ;;  %s556_s4 = smov 8  }
 0x1f6   :  { %346 = dma.vmem_to_hbm [thread:$0]  %s341_s11, 256, %s610_s5, [#allocation5], %s555_s13, %s555_s13, %s556_s4  }
 0x1f7   :  { %545 = dma.done.wait [#allocation5], 256  }
 0x1f8   :  { %546 = vsyncadd [#allocation5], 4294967040 }
 0x1f9   :  { %350 = vsyncpa [#allocation4], 1 }
 0x1fa   :  { %351 = vsyncpa [#allocation7], 1 }
 0x1fb   :  { %352 = vsyncpa [#allocation5], 1 }

</bundles_post_ra>
